<compile_context>
chip_gen: v7x
topology: tpu7x:2x2x1
jax: 0.10.0
libtpu: 0.0.40
codegen_flags: <defaults>
</compile_context>

<pallas_src>
import functools

import jax
import jax.numpy as jnp
from jax.experimental import pallas as pl
from jax.experimental.pallas import tpu as pltpu

LANE = 128  # TPU lane width


# ----------------------------------------------------------------------------
# helpers
# ----------------------------------------------------------------------------
def _round_up(x, m):
    return ((x + m - 1) // m) * m


def _best_tile(n_pad, cap):
    """Largest multiple of LANE that is <= cap and divides n_pad."""
    cap = max(LANE, min(cap, n_pad))
    cap -= cap % LANE
    for t in range(cap, 0, -LANE):
        if n_pad % t == 0:
            return t
    return LANE


def _choose_node_tiles(n, max_tile=1024):
    """Pad N to a multiple of 128 and pick row/k node tiles dividing n_pad."""
    n_pad = _round_up(max(n, 1), LANE)
    # Row (parallel) axis: prefer >= 2 tiles so both v7x TensorCores get work.
    tm_cap = max_tile if n_pad < 2 * LANE else min(max_tile, n_pad // 2)
    tm = _best_tile(n_pad, tm_cap)
    tk = _best_tile(n_pad, max_tile)
    return n_pad, tm, tk


def _pad2d(x, rows, cols):
    r, c = x.shape
    return jnp.pad(x, ((0, rows - r), (0, cols - c)))


# ----------------------------------------------------------------------------
# Fused GCN layer kernel:  out = act( (A_hat @ X) @ W + b )
# ----------------------------------------------------------------------------
def _gcn_layer_kernel(a_ref, x_ref, w_ref, b_ref, o_ref, acc_ref, *,
                      tk, x_resident, apply_relu):
    k = pl.program_id(1)

    @pl.when(k == 0)
    def _():
        acc_ref[...] = jnp.zeros_like(acc_ref)

    if x_resident:
        # Whole X lives in VMEM (constant block index); slice the K chunk.
        start = pl.multiple_of(k * tk, tk)
        x_blk = x_ref[pl.ds(start, tk), :]
    else:
        x_blk = x_ref[...]

    acc_ref[...] += jnp.dot(a_ref[...], x_blk,
                            preferred_element_type=jnp.float32)

    @pl.when(k == pl.num_programs(1) - 1)
    def _():
        # f32 accumulator @ f32 W (no re-rounding of partial sums), f32 epilogue.
        out = jnp.dot(acc_ref[...], w_ref[...],
                      preferred_element_type=jnp.float32)
        out = out + b_ref[...]
        if apply_relu:
            out = jnp.maximum(out, 0.0)
        o_ref[...] = out.astype(o_ref.dtype)


def gcn_layer(a_pad, x_pad, w_pad, b_pad, *, tm, tk, apply_relu, out_dtype):
    """One GCNConv layer on padded, lane-dense operands.

    a_pad: (n_pad, n_pad) mxu_dtype, x_pad: (n_pad, f_in_pad) mxu_dtype,
    w_pad: (f_in_pad, f_out_pad) f32, b_pad: (1, f_out_pad) f32.
    Returns (n_pad, f_out_pad) in out_dtype.
    """
    n_pad = a_pad.shape[0]
    f_in_pad = x_pad.shape[1]
    f_out_pad = w_pad.shape[1]
    a_bytes = a_pad.dtype.itemsize
    x_bytes = x_pad.dtype.itemsize
    out_bytes = jnp.dtype(out_dtype).itemsize

    def vmem_estimate(resident):
        x_rows = n_pad if resident else tk
        return (2 * tm * tk * a_bytes                 # A tiles (double buffer)
                + 2 * x_rows * f_in_pad * x_bytes     # X (resident or streamed)
                + 2 * f_in_pad * f_out_pad * 4        # W
                + 2 * 8 * f_out_pad * 4               # bias (sublane padded)
                + 2 * tm * f_out_pad * out_bytes      # output tiles
                + tm * f_in_pad * 4)                  # f32 accumulator scratch

    # Keep X VMEM-resident unless it would blow the budget; then stream it.
    x_resident = vmem_estimate(True) <= 28 * 1024 * 1024
    vmem_limit = int(min(max(2 * vmem_estimate(x_resident), 32 * 1024 * 1024),
                         48 * 1024 * 1024))

    if x_resident:
        x_spec = pl.BlockSpec((n_pad, f_in_pad), lambda i, k: (0, 0))
    else:
        x_spec = pl.BlockSpec((tk, f_in_pad), lambda i, k: (k, 0))

    kernel = functools.partial(_gcn_layer_kernel, tk=tk,
                               x_resident=x_resident, apply_relu=apply_relu)

    return pl.pallas_call(
        kernel,
        out_shape=jax.ShapeDtypeStruct((n_pad, f_out_pad), out_dtype),
        grid=(n_pad // tm, n_pad // tk),
        in_specs=[
            pl.BlockSpec((tm, tk), lambda i, k: (i, k)),        # A_hat tile
            x_spec,                                             # X / H
            pl.BlockSpec((f_in_pad, f_out_pad), lambda i, k: (0, 0)),  # W
            pl.BlockSpec((1, f_out_pad), lambda i, k: (0, 0)),  # b
        ],
        out_specs=pl.BlockSpec((tm, f_out_pad), lambda i, k: (i, 0)),
        scratch_shapes=[pltpu.VMEM((tm, f_in_pad), jnp.float32)],
        compiler_params=pltpu.CompilerParams(
            dimension_semantics=("parallel", "arbitrary"),
            vmem_limit_bytes=vmem_limit),
    )(a_pad, x_pad, w_pad, b_pad)


# ----------------------------------------------------------------------------
# Dense normalized adjacency (GCNConv's gcn_norm with self-loops)
# ----------------------------------------------------------------------------
def build_normalized_adjacency(edge_index, num_nodes, dtype=jnp.float32):
    src, dst = edge_index[0], edge_index[1]
    adj = jnp.zeros((num_nodes, num_nodes), dtype=dtype)
    # scatter-add (duplicate edges sum, matching gcn_norm)
    adj = adj.at[dst, src].add(1.0)
    adj = adj + jnp.eye(num_nodes, dtype=dtype)
    deg = jnp.sum(adj, axis=1)
    dinv = jnp.where(deg > 0, 1.0 / jnp.sqrt(deg), 0.0)
    return adj * dinv[:, None] * dinv[None, :]


# ----------------------------------------------------------------------------
# Full GCN forward (eval mode).  a_hat is built once by the caller and reused.
# ----------------------------------------------------------------------------
def gcn_forward(x, a_hat, params, *, mxu_dtype=None):
    # bf16 default on all generations: the kernel is HBM-bound on A_hat bytes,
    # and the MXU on v5e/v6e/v7x natively takes bf16 (f32 accumulation).
    mxu_dtype = jnp.bfloat16 if mxu_dtype is None else mxu_dtype

    n, f_in = x.shape
    hidden = params["w1"].shape[1]
    n_classes = params["w2"].shape[1]

    n_pad, tm, tk = _choose_node_tiles(n)
    f_in_pad = _round_up(f_in, LANE)
    hid_pad = _round_up(hidden, LANE)
    cls_pad = _round_up(n_classes, LANE)

    a_pad = _pad2d(a_hat, n_pad, n_pad).astype(mxu_dtype)
    x_pad = _pad2d(x, n_pad, f_in_pad).astype(mxu_dtype)
    # Weights / bias stay f32: they are tiny (<=128x128, no HBM cost) and the
    # f32-acc @ f32-W epilogue avoids re-rounding partial sums to bf16.
    w1 = _pad2d(params["w1"], f_in_pad, hid_pad).astype(jnp.float32)
    b1 = _pad2d(params["b1"].reshape(1, -1), 1, hid_pad).astype(jnp.float32)
    w2 = _pad2d(params["w2"], hid_pad, cls_pad).astype(jnp.float32)
    b2 = _pad2d(params["b2"].reshape(1, -1), 1, cls_pad).astype(jnp.float32)

    # dropout(p=0.6) is identity in eval mode.
    # Layer 1: hidden emitted directly in mxu_dtype (no separate cast pass).
    h = gcn_layer(a_pad, x_pad, w1, b1, tm=tm, tk=tk, apply_relu=True,
                  out_dtype=mxu_dtype)
    # Layer 2: logits in f32.
    out = gcn_layer(a_pad, h, w2, b2, tm=tm, tk=tk, apply_relu=False,
                    out_dtype=jnp.float32)
    return out[:n, :n_classes]


def init_params(key, num_features, hidden_features, num_classes):
    k1, k2 = jax.random.split(key)

    def glorot(k, fan_in, fan_out):
        limit = jnp.sqrt(6.0 / (fan_in + fan_out))
        return jax.random.uniform(
            k, (fan_in, fan_out), minval=-limit, maxval=limit,
            dtype=jnp.float32)

    return {
        "w1": glorot(k1, num_features, hidden_features),
        "b1": jnp.zeros((hidden_features,), jnp.float32),
        "w2": glorot(k2, hidden_features, num_classes),
        "b2": jnp.zeros((num_classes,), jnp.float32),
    }


# ----------------------------------------------------------------------------
# Reference (plain JAX).  mxu_dtype mirrors the kernel's input rounding.
# ----------------------------------------------------------------------------
def gcn_forward_ref(x, a_hat, params, mxu_dtype=jnp.float32):
    f32 = jnp.float32
    a = a_hat.astype(mxu_dtype).astype(f32)
    xx = x.astype(mxu_dtype).astype(f32)
    h = jnp.maximum(a @ (xx @ params["w1"]) + params["b1"], 0.0)
    h = h.astype(mxu_dtype).astype(f32)
    return a @ (h @ params["w2"]) + params["b2"]


if __name__ == "__main__":
    key = jax.random.PRNGKey(0)
    kx, kp = jax.random.split(key)

    num_nodes = 8
    num_features = 16
    hidden_features = 32
    num_classes = 4

    x = jax.random.normal(kx, (num_nodes, num_features), dtype=jnp.float32)

    # small deterministic undirected graph: ring over 8 nodes + a chord (0-4)
    src = jnp.array([0, 1, 1, 2, 2, 3, 3, 4, 4, 5, 5, 6, 6, 7, 7, 0, 0, 4],
                    dtype=jnp.int32)
    dst = jnp.array([1, 0, 2, 1, 3, 2, 4, 3, 5, 4, 6, 5, 7, 6, 0, 7, 4, 0],
                    dtype=jnp.int32)
    edge_index = jnp.stack([src, dst], axis=0)

    params = init_params(kp, num_features, hidden_features, num_classes)

    # Build the dense normalized adjacency ONCE, reused across layers/calls.
    a_hat = build_normalized_adjacency(edge_index, num_nodes, dtype=jnp.float32)

    fwd = jax.jit(gcn_forward, static_argnames=("mxu_dtype",))

    # Default (bf16 MXU inputs) path.
    out_bf16 = jax.block_until_ready(fwd(x, a_hat, params,
                                         mxu_dtype=jnp.bfloat16))
    assert out_bf16.shape == (num_nodes, num_classes)
    ref_bf16 = gcn_forward_ref(x, a_hat, params, mxu_dtype=jnp.bfloat16)
    assert jnp.allclose(out_bf16, ref_bf16, atol=1e-2, rtol=1e-2), (
        float(jnp.max(jnp.abs(out_bf16 - ref_bf16))))

    # Full-f32 path (exact check against the plain reference).
    out_f32 = jax.block_until_ready(fwd(x, a_hat, params,
                                        mxu_dtype=jnp.float32))
    ref_f32 = gcn_forward_ref(x, a_hat, params, mxu_dtype=jnp.float32)
    assert jnp.allclose(out_f32, ref_f32, atol=1e-4, rtol=1e-4), (
        float(jnp.max(jnp.abs(out_f32 - ref_f32))))

    print("KERNEL_OK")
</pallas_src>

<mosaic_0001>
module attributes {stable_mosaic.version = 11 : i64} {
  func.func @_gcn_layer_kernel(%arg0: i32, %arg1: i32, %arg2: memref<128x128xbf16, #tpu.memory_space<vmem>>, %arg3: memref<128x128xbf16, #tpu.memory_space<vmem>>, %arg4: memref<128x128xf32, #tpu.memory_space<vmem>>, %arg5: memref<1x128xf32, #tpu.memory_space<vmem>>, %arg6: memref<128x128xbf16, #tpu.memory_space<vmem>>, %arg7: memref<128x128xf32, #tpu.memory_space<vmem>>) attributes {dimension_semantics = [#tpu.dimension_semantics<parallel>, #tpu.dimension_semantics<arbitrary>], iteration_bounds = array<i64: 1, 1>, scalar_prefetch = 0 : i64, scratch_operands = 1 : i64, tpu.core_type = #tpu.core_type<tc>, window_params = [{transform_indices = @transform_0, window_bounds = array<i64: 128, 128>}, {pipeline_mode = #tpu.pipeline_mode<synchronous>, transform_indices = @transform_1, window_bounds = array<i64: 128, 128>}, {pipeline_mode = #tpu.pipeline_mode<synchronous>, transform_indices = @transform_2, window_bounds = array<i64: 128, 128>}, {pipeline_mode = #tpu.pipeline_mode<synchronous>, transform_indices = @transform_3, window_bounds = array<i64: 1, 128>}, {transform_indices = @transform_4, window_bounds = array<i64: 128, 128>}]} {
    %c0_i32 = arith.constant 0 : i32
    %0 = arith.cmpi eq, %arg1, %c0_i32 : i32
    %1 = arith.extui %0 : i1 to i32
    %c0_i32_0 = arith.constant 0 : i32
    %2 = arith.cmpi ne, %1, %c0_i32_0 : i32
    scf.if %2 {
      %cst_9 = arith.constant 0.000000e+00 : f32
      %15 = vector.broadcast %cst_9 : f32 to vector<128x128xf32>
      %c0_10 = arith.constant 0 : index
      %c0_11 = arith.constant 0 : index
      %16 = vector.load %arg7[%c0_10, %c0_11] : memref<128x128xf32, #tpu.memory_space<vmem>>, vector<128x128xf32>
      tpu.vector_store %arg7[%c0_10, %c0_11], %15 {strides = array<i32>} : memref<128x128xf32, #tpu.memory_space<vmem>>, vector<128x128xf32>,
    } else {
    }
    %c128_i32 = arith.constant 128 : i32
    %3 = arith.muli %arg1, %c128_i32 : i32
    %4 = tpu.assume_multiple %3, 128 : i32
    %5 = arith.index_cast %4 : i32 to index
    %c0 = arith.constant 0 : index
    %6 = vector.load %arg3[%5, %c0] : memref<128x128xbf16, #tpu.memory_space<vmem>>, vector<128x128xbf16>
    %c0_1 = arith.constant 0 : index
    %c0_2 = arith.constant 0 : index
    %7 = vector.load %arg7[%c0_1, %c0_2] : memref<128x128xf32, #tpu.memory_space<vmem>>, vector<128x128xf32>
    %c0_3 = arith.constant 0 : index
    %c0_4 = arith.constant 0 : index
    %8 = vector.load %arg2[%c0_3, %c0_4] : memref<128x128xbf16, #tpu.memory_space<vmem>>, vector<128x128xbf16>
    %cst = arith.constant dense<0.000000e+00> : vector<128x128xf32>
    %9 = tpu.matmul %8, %6, %cst {dimension_numbers = #tpu.dot_dimension_numbers<[1], [0], [0], [1], [0, 0, 1, 1], [], []>} : vector<128x128xbf16>, vector<128x128xbf16>, vector<128x128xf32> -> vector<128x128xf32>
    %10 = arith.addf %7, %9 : vector<128x128xf32>
    %c0_5 = arith.constant 0 : index
    %c0_6 = arith.constant 0 : index
    %11 = vector.load %arg7[%c0_5, %c0_6] : memref<128x128xf32, #tpu.memory_space<vmem>>, vector<128x128xf32>
    tpu.vector_store %arg7[%c0_5, %c0_6], %10 {strides = array<i32>} : memref<128x128xf32, #tpu.memory_space<vmem>>, vector<128x128xf32>,
    %c0_i32_7 = arith.constant 0 : i32
    %12 = arith.cmpi eq, %arg1, %c0_i32_7 : i32
    %13 = arith.extui %12 : i1 to i32
    %c0_i32_8 = arith.constant 0 : i32
    %14 = arith.cmpi ne, %13, %c0_i32_8 : i32
    scf.if %14 {
      %c0_9 = arith.constant 0 : index
      %c0_10 = arith.constant 0 : index
      %15 = vector.load %arg7[%c0_9, %c0_10] : memref<128x128xf32, #tpu.memory_space<vmem>>, vector<128x128xf32>
      %c0_11 = arith.constant 0 : index
      %c0_12 = arith.constant 0 : index
      %16 = vector.load %arg4[%c0_11, %c0_12] : memref<128x128xf32, #tpu.memory_space<vmem>>, vector<128x128xf32>
      %cst_13 = arith.constant dense<0.000000e+00> : vector<128x128xf32>
      %17 = tpu.matmul %15, %16, %cst_13 {dimension_numbers = #tpu.dot_dimension_numbers<[1], [0], [0], [1], [0, 0, 1, 1], [], []>} : vector<128x128xf32>, vector<128x128xf32>, vector<128x128xf32> -> vector<128x128xf32>
      %c0_14 = arith.constant 0 : index
      %c0_15 = arith.constant 0 : index
      %18 = vector.load %arg5[%c0_14, %c0_15] : memref<1x128xf32, #tpu.memory_space<vmem>>, vector<1x128xf32>
      %19 = vector.broadcast %18 : vector<1x128xf32> to vector<128x128xf32>
      %20 = arith.addf %17, %19 : vector<128x128xf32>
      %cst_16 = arith.constant 0.000000e+00 : f32
      %21 = vector.broadcast %cst_16 : f32 to vector<128x128xf32>
      %22 = arith.maximumf %20, %21 : vector<128x128xf32>
      %23 = arith.truncf %22 : vector<128x128xf32> to vector<128x128xbf16>
      %c0_17 = arith.constant 0 : index
      %c0_18 = arith.constant 0 : index
      %24 = vector.load %arg6[%c0_17, %c0_18] : memref<128x128xbf16, #tpu.memory_space<vmem>>, vector<128x128xbf16>
      tpu.vector_store %arg6[%c0_17, %c0_18], %23 {strides = array<i32>} : memref<128x128xbf16, #tpu.memory_space<vmem>>, vector<128x128xbf16>,
    } else {
    }
    return
  }
  func.func @transform_0(%arg0: i32, %arg1: i32) -> (i32, i32) {
    %c0_i32 = arith.constant 0 : i32
    return %arg0, %arg1 : i32, i32
  }
  func.func @transform_1(%arg0: i32, %arg1: i32) -> (i32, i32) {
    %c0_i32 = arith.constant 0 : i32
    %c0_i32_0 = arith.constant 0 : i32
    %c0_i32_1 = arith.constant 0 : i32
    return %c0_i32, %c0_i32_0 : i32, i32
  }
  func.func @transform_2(%arg0: i32, %arg1: i32) -> (i32, i32) {
    %c0_i32 = arith.constant 0 : i32
    %c0_i32_0 = arith.constant 0 : i32
    %c0_i32_1 = arith.constant 0 : i32
    return %c0_i32, %c0_i32_0 : i32, i32
  }
  func.func @transform_3(%arg0: i32, %arg1: i32) -> (i32, i32) {
    %c0_i32 = arith.constant 0 : i32
    %c0_i32_0 = arith.constant 0 : i32
    %c0_i32_1 = arith.constant 0 : i32
    return %c0_i32, %c0_i32_0 : i32, i32
  }
  func.func @transform_4(%arg0: i32, %arg1: i32) -> (i32, i32) {
    %c0_i32 = arith.constant 0 : i32
    %c0_i32_0 = arith.constant 0 : i32
    return %arg0, %c0_i32 : i32, i32
  }
}

module attributes {stable_mosaic.version = 11 : i64} {
  func.func @_gcn_layer_kernel(%arg0: i32, %arg1: i32, %arg2: memref<128x128xbf16, #tpu.memory_space<vmem>>, %arg3: memref<128x128xbf16, #tpu.memory_space<vmem>>, %arg4: memref<128x128xf32, #tpu.memory_space<vmem>>, %arg5: memref<1x128xf32, #tpu.memory_space<vmem>>, %arg6: memref<128x128xf32, #tpu.memory_space<vmem>>, %arg7: memref<128x128xf32, #tpu.memory_space<vmem>>) attributes {dimension_semantics = [#tpu.dimension_semantics<parallel>, #tpu.dimension_semantics<arbitrary>], iteration_bounds = array<i64: 1, 1>, scalar_prefetch = 0 : i64, scratch_operands = 1 : i64, tpu.core_type = #tpu.core_type<tc>, window_params = [{transform_indices = @transform_0, window_bounds = array<i64: 128, 128>}, {pipeline_mode = #tpu.pipeline_mode<synchronous>, transform_indices = @transform_1, window_bounds = array<i64: 128, 128>}, {pipeline_mode = #tpu.pipeline_mode<synchronous>, transform_indices = @transform_2, window_bounds = array<i64: 128, 128>}, {pipeline_mode = #tpu.pipeline_mode<synchronous>, transform_indices = @transform_3, window_bounds = array<i64: 1, 128>}, {transform_indices = @transform_4, window_bounds = array<i64: 128, 128>}]} {
    %c0_i32 = arith.constant 0 : i32
    %0 = arith.cmpi eq, %arg1, %c0_i32 : i32
    %1 = arith.extui %0 : i1 to i32
    %c0_i32_0 = arith.constant 0 : i32
    %2 = arith.cmpi ne, %1, %c0_i32_0 : i32
    scf.if %2 {
      %cst_9 = arith.constant 0.000000e+00 : f32
      %15 = vector.broadcast %cst_9 : f32 to vector<128x128xf32>
      %c0_10 = arith.constant 0 : index
      %c0_11 = arith.constant 0 : index
      %16 = vector.load %arg7[%c0_10, %c0_11] : memref<128x128xf32, #tpu.memory_space<vmem>>, vector<128x128xf32>
      tpu.vector_store %arg7[%c0_10, %c0_11], %15 {strides = array<i32>} : memref<128x128xf32, #tpu.memory_space<vmem>>, vector<128x128xf32>,
    } else {
    }
    %c128_i32 = arith.constant 128 : i32
    %3 = arith.muli %arg1, %c128_i32 : i32
    %4 = tpu.assume_multiple %3, 128 : i32
    %5 = arith.index_cast %4 : i32 to index
    %c0 = arith.constant 0 : index
    %6 = vector.load %arg3[%5, %c0] : memref<128x128xbf16, #tpu.memory_space<vmem>>, vector<128x128xbf16>
    %c0_1 = arith.constant 0 : index
    %c0_2 = arith.constant 0 : index
    %7 = vector.load %arg7[%c0_1, %c0_2] : memref<128x128xf32, #tpu.memory_space<vmem>>, vector<128x128xf32>
    %c0_3 = arith.constant 0 : index
    %c0_4 = arith.constant 0 : index
    %8 = vector.load %arg2[%c0_3, %c0_4] : memref<128x128xbf16, #tpu.memory_space<vmem>>, vector<128x128xbf16>
    %cst = arith.constant dense<0.000000e+00> : vector<128x128xf32>
    %9 = tpu.matmul %8, %6, %cst {dimension_numbers = #tpu.dot_dimension_numbers<[1], [0], [0], [1], [0, 0, 1, 1], [], []>} : vector<128x128xbf16>, vector<128x128xbf16>, vector<128x128xf32> -> vector<128x128xf32>
    %10 = arith.addf %7, %9 : vector<128x128xf32>
    %c0_5 = arith.constant 0 : index
    %c0_6 = arith.constant 0 : index
    %11 = vector.load %arg7[%c0_5, %c0_6] : memref<128x128xf32, #tpu.memory_space<vmem>>, vector<128x128xf32>
    tpu.vector_store %arg7[%c0_5, %c0_6], %10 {strides = array<i32>} : memref<128x128xf32, #tpu.memory_space<vmem>>, vector<128x128xf32>,
    %c0_i32_7 = arith.constant 0 : i32
    %12 = arith.cmpi eq, %arg1, %c0_i32_7 : i32
    %13 = arith.extui %12 : i1 to i32
    %c0_i32_8 = arith.constant 0 : i32
    %14 = arith.cmpi ne, %13, %c0_i32_8 : i32
    scf.if %14 {
      %c0_9 = arith.constant 0 : index
      %c0_10 = arith.constant 0 : index
      %15 = vector.load %arg7[%c0_9, %c0_10] : memref<128x128xf32, #tpu.memory_space<vmem>>, vector<128x128xf32>
      %c0_11 = arith.constant 0 : index
      %c0_12 = arith.constant 0 : index
      %16 = vector.load %arg4[%c0_11, %c0_12] : memref<128x128xf32, #tpu.memory_space<vmem>>, vector<128x128xf32>
      %cst_13 = arith.constant dense<0.000000e+00> : vector<128x128xf32>
      %17 = tpu.matmul %15, %16, %cst_13 {dimension_numbers = #tpu.dot_dimension_numbers<[1], [0], [0], [1], [0, 0, 1, 1], [], []>} : vector<128x128xf32>, vector<128x128xf32>, vector<128x128xf32> -> vector<128x128xf32>
      %c0_14 = arith.constant 0 : index
      %c0_15 = arith.constant 0 : index
      %18 = vector.load %arg5[%c0_14, %c0_15] : memref<1x128xf32, #tpu.memory_space<vmem>>, vector<1x128xf32>
      %19 = vector.broadcast %18 : vector<1x128xf32> to vector<128x128xf32>
      %20 = arith.addf %17, %19 : vector<128x128xf32>
      %c0_16 = arith.constant 0 : index
      %c0_17 = arith.constant 0 : index
      %21 = vector.load %arg6[%c0_16, %c0_17] : memref<128x128xf32, #tpu.memory_space<vmem>>, vector<128x128xf32>
      tpu.vector_store %arg6[%c0_16, %c0_17], %20 {strides = array<i32>} : memref<128x128xf32, #tpu.memory_space<vmem>>, vector<128x128xf32>,
    } else {
    }
    return
  }
  func.func @transform_0(%arg0: i32, %arg1: i32) -> (i32, i32) {
    %c0_i32 = arith.constant 0 : i32
    return %arg0, %arg1 : i32, i32
  }
  func.func @transform_1(%arg0: i32, %arg1: i32) -> (i32, i32) {
    %c0_i32 = arith.constant 0 : i32
    %c0_i32_0 = arith.constant 0 : i32
    %c0_i32_1 = arith.constant 0 : i32
    return %c0_i32, %c0_i32_0 : i32, i32
  }
  func.func @transform_2(%arg0: i32, %arg1: i32) -> (i32, i32) {
    %c0_i32 = arith.constant 0 : i32
    %c0_i32_0 = arith.constant 0 : i32
    %c0_i32_1 = arith.constant 0 : i32
    return %c0_i32, %c0_i32_0 : i32, i32
  }
  func.func @transform_3(%arg0: i32, %arg1: i32) -> (i32, i32) {
    %c0_i32 = arith.constant 0 : i32
    %c0_i32_0 = arith.constant 0 : i32
    %c0_i32_1 = arith.constant 0 : i32
    return %c0_i32, %c0_i32_0 : i32, i32
  }
  func.func @transform_4(%arg0: i32, %arg1: i32) -> (i32, i32) {
    %c0_i32 = arith.constant 0 : i32
    %c0_i32_0 = arith.constant 0 : i32
    return %arg0, %c0_i32 : i32, i32
  }
}

</mosaic_0001>

<bundles_post_ra>
// kernel: gcn_forward.3
= control target key start
LH: loop header
LB: loop body
LE: loop exit
PB: predicated region body
PF: predicated region fallthrough
CT: control target
= control target key end

     0   :  { %s898_s1 = inlined_call_operand.vmem [shape: bf16[128,128], index: 1, kind: input, shape index: {}]   ;;  %s899_s0 = inlined_call_operand.vmem [shape: bf16[128,128], index: 0, kind: input, shape index: {}]   ;;  %s900_s2 = inlined_call_operand.vmem [shape: f32[128,128], index: 2, kind: input, shape index: {}]   ;;  %s901_s3 = inlined_call_operand.vmem [shape: f32[1,128], index: 3, kind: input, shape index: {}]   ;;  %s902_s4 = inlined_call_operand.vmem [shape: f32[128,128], index: 4, kind: output, shape index: {}]  }
   0x1   :  { %v710_v0 = vld [vmem:[%s898_s1] sm:$0xff]   ;;  %v711_v1 = vld [vmem:[%s898_s1 + $0x8] sm:$0xff]   ;;  %v712_v2 = vld [vmem:[%s898_s1 + $0x10] sm:$0xff]  }
   0x2   :  { %590 = vmatprep.subr.bf16.mxu0 %v710_v0  ;;  %v713_v3 = vld [vmem:[%s898_s1 + $0x18] sm:$0xff]   ;;  %v718_v4 = vld [vmem:[%s899_s0] sm:$0xff]   ;;  %v715_v6 = vld [vmem:[%s898_s1 + $0x28] sm:$0xff]  }
   0x3   :  { %591 = vmatpush3.bf16.msra.mxu0 %v710_v0  ;;  %606 = vmatprep.mubr.bf16.mxu0 %v718_v4  ;;  %v714_v5 = vld [vmem:[%s898_s1 + $0x20] sm:$0xff]   ;;  %v336_v8 = vld [vmem:[%s900_s2 + $0x8] sm:$0xff]  ;;  %v337_v9 = vld [vmem:[%s900_s2 + $0x10] sm:$0xff] }
   0x4   :  { %592 = vmatprep.subr.bf16.mxu0 %v711_v1  ;;  %v335_v7 = vld [vmem:[%s900_s2] sm:$0xff]  ;;  %v338_v11 = vld [vmem:[%s900_s2 + $0x18] sm:$0xff]  ;;  %v340_v14 = vld [vmem:[%s900_s2 + $0x28] sm:$0xff] }
   0x5   :  { %v678_v10 = vpack.c.bf16 %v336_v8, %v335_v7  ;;  %v682_v12 = vpack.c.bf16 %v338_v11, %v337_v9  ;;  %v339_v13 = vld [vmem:[%s900_s2 + $0x20] sm:$0xff]  ;;  %v716_v15 = vld [vmem:[%s898_s1 + $0x30] sm:$0xff]   ;;  %v342_v18 = vld [vmem:[%s900_s2 + $0x38] sm:$0xff] }
   0x6   :  { %v686_v16 = vpack.c.bf16 %v340_v14, %v339_v13  ;;  %v341_v17 = vld [vmem:[%s900_s2 + $0x30] sm:$0xff]  ;;  %v717_v19 = vld [vmem:[%s898_s1 + $0x38] sm:$0xff]   ;;  %v343_v21 = vld [vmem:[%s900_s2 + $0x40] sm:$0xff] }
   0x7   :  { %593 = vmatpush3.bf16.msra.mxu0 %v711_v1  ;;  %679 = vmatprep.subr.bf16.mxu1 %v678_v10  ;;  %v690_v20 = vpack.c.bf16 %v342_v18, %v341_v17  ;;  %v344_v22 = vld [vmem:[%s900_s2 + $0x48] sm:$0xff]  ;;  %v345_v25 = vld [vmem:[%s900_s2 + $0x50] sm:$0xff]  ;;  %v346_v26 = vld [vmem:[%s900_s2 + $0x58] sm:$0xff] }
   0x8   :  { %594 = vmatprep.subr.bf16.mxu0 %v712_v2  ;;  %681 = vmatpush3.bf16.msra.mxu1 %v678_v10  ;;  %v694_v23 = vpack.c.bf16 %v344_v22, %v343_v21  ;;  %v719_v24 = vld [vmem:[%s899_s0 + $0x8] sm:$0xff]   ;;  %v720_v27 = vld [vmem:[%s899_s0 + $0x10] sm:$0xff]   ;;  %v698_v28 = vpack.c.bf16 %v346_v26, %v345_v25  ;;  %v347_v29 = vld [vmem:[%s900_s2 + $0x60] sm:$0xff] }
   0x9   :  { %683 = vmatprep.subr.bf16.mxu1 %v682_v12  ;;  %v348_v30 = vld [vmem:[%s900_s2 + $0x68] sm:$0xff]  ;;  %v721_v32 = vld [vmem:[%s899_s0 + $0x18] sm:$0xff]   ;;  %v722_v33 = vld [vmem:[%s899_s0 + $0x20] sm:$0xff]  }
   0xa   :  { %v702_v31 = vpack.c.bf16 %v348_v30, %v347_v29  ;;  %v723_v34 = vld [vmem:[%s899_s0 + $0x28] sm:$0xff]   ;;  %v724_v35 = vld [vmem:[%s899_s0 + $0x30] sm:$0xff]   ;;  %v725_v36 = vld [vmem:[%s899_s0 + $0x38] sm:$0xff]  }
   0xb   :  { %595 = vmatpush3.bf16.msra.mxu0 %v712_v2  ;;  %v349_v37 = vld [vmem:[%s900_s2 + $0x70] sm:$0xff]  ;;  %v350_v38 = vld [vmem:[%s900_s2 + $0x78] sm:$0xff]  ;;  %v541_v56 = vld [vmem:[%s901_s3] ss:$0 sm:$0xff] }
   0xc   :  { %596 = vmatprep.subr.bf16.mxu0 %v713_v3  ;;  %685 = vmatpush3.bf16.msra.mxu1 %v682_v12  ;;  %v706_v39 = vpack.c.bf16 %v350_v38, %v349_v37 }
   0xd   :  { %687 = vmatprep.subr.bf16.mxu1 %v686_v16 }
   0xf   :  { %597 = vmatpush3.bf16.msra.mxu0 %v713_v3 }
  0x10   :  { %598 = vmatprep.subr.bf16.mxu0 %v714_v5  ;;  %689 = vmatpush3.bf16.msra.mxu1 %v686_v16 }
  0x11   :  { %691 = vmatprep.subr.bf16.mxu1 %v690_v20 }
  0x13   :  { %599 = vmatpush3.bf16.msra.mxu0 %v714_v5 }
  0x14   :  { %600 = vmatprep.subr.bf16.mxu0 %v715_v6  ;;  %693 = vmatpush3.bf16.msra.mxu1 %v690_v20 }
  0x15   :  { %695 = vmatprep.subr.bf16.mxu1 %v694_v23 }
  0x17   :  { %601 = vmatpush3.bf16.msra.mxu0 %v715_v6 }
  0x18   :  { %602 = vmatprep.subr.bf16.mxu0 %v716_v15  ;;  %697 = vmatpush3.bf16.msra.mxu1 %v694_v23 }
  0x19   :  { %699 = vmatprep.subr.bf16.mxu1 %v698_v28 }
  0x1b   :  { %603 = vmatpush3.bf16.msra.mxu0 %v716_v15 }
  0x1c   :  { %604 = vmatprep.subr.bf16.mxu0 %v717_v19  ;;  %701 = vmatpush3.bf16.msra.mxu1 %v698_v28 }
  0x1d   :  { %703 = vmatprep.subr.bf16.mxu1 %v702_v31 }
  0x1f   :  { %605 = vmatpush3.bf16.msra.mxu0 %v717_v19 }
  0x20   :  { %705 = vmatpush3.bf16.msra.mxu1 %v702_v31 }
  0x21   :  { %707 = vmatprep.subr.bf16.mxu1 %v706_v39 }
  0x22   :  { %607 = vmatmul.mubr.bf16.vlgmr.msra.gmra.mrb[0].mxu0 %v719_v24 }
  0x23   :  { %610 = vmatprep.mubr.bf16.mxu0 %v720_v27 }
  0x24   :  { %709 = vmatpush3.bf16.msra.mxu1 %v706_v39 }
  0x2a   :  { %611 = vmatmul.mubr.bf16.gmra.mrb[4].mxu0 %v721_v32 }
  0x2b   :  { %614 = vmatprep.mubr.bf16.mxu0 %v722_v33 }
  0x32   :  { %615 = vmatmul.mubr.bf16.gmra.mrb[8].mxu0 %v723_v34 }
  0x33   :  { %618 = vmatprep.mubr.bf16.mxu0 %v724_v35 }
  0x3a   :  { %619 = vmatmul.mubr.bf16.gmra.mrb[12].mxu0 %v725_v36 }
  0xf5   :  { %v608_v40 = vpop.f32.mrb[0].mxu0 }
  0xf6   :  { %v221_v41 = vpop.f32.mrb[1].mxu0 }
  0xf7   :  { %v609_v42 = vpop.f32.mrb[2].mxu0  ;;  %654 = vmatprep.mubr.f32.mxu1 %v221_v41 }
  0xf8   :  { %v224_v43 = vpop.f32.mrb[3].mxu0 }
  0xf9   :  { %655 = vmatmul.mubr.f32.vlgmr.msra.gmra.mrb[0].mxu1 %v224_v43 }
  0xfa   :  { %657 = vmatprep.mubr.f32.mxu1 %v608_v40 }
  0xfd   :  { %v612_v44 = vpop.f32.mrb[4].mxu0  ;;  %658 = vmatmul.mubr.f32.gmra.mrb[2].mxu1 %v609_v42 }
  0xfe   :  { %v237_v45 = vpop.f32.mrb[5].mxu0 }
  0xff   :  { %v613_v46 = vpop.f32.mrb[6].mxu0  ;;  %660 = vmatprep.mubr.f32.mxu1 %v237_v45 }
 0x100   :  { %v240_v47 = vpop.f32.mrb[7].mxu0 }
 0x101   :  { %661 = vmatmul.mubr.f32.gmra.mrb[4].mxu1 %v240_v47 }
 0x102   :  { %663 = vmatprep.mubr.f32.mxu1 %v612_v44 }
 0x105   :  { %v616_v48 = vpop.f32.mrb[8].mxu0  ;;  %664 = vmatmul.mubr.f32.gmra.mrb[6].mxu1 %v613_v46 }
 0x106   :  { %v253_v49 = vpop.f32.mrb[9].mxu0 }
 0x107   :  { %v617_v50 = vpop.f32.mrb[10].mxu0  ;;  %666 = vmatprep.mubr.f32.mxu1 %v253_v49 }
 0x108   :  { %v256_v51 = vpop.f32.mrb[11].mxu0 }
 0x109   :  { %667 = vmatmul.mubr.f32.gmra.mrb[8].mxu1 %v256_v51 }
 0x10a   :  { %669 = vmatprep.mubr.f32.mxu1 %v616_v48 }
 0x10d   :  { %v620_v52 = vpop.f32.mrb[12].mxu0  ;;  %670 = vmatmul.mubr.f32.gmra.mrb[10].mxu1 %v617_v50 }
 0x10e   :  { %v269_v53 = vpop.f32.mrb[13].mxu0 }
 0x10f   :  { %v621_v54 = vpop.f32.mrb[14].mxu0  ;;  %672 = vmatprep.mubr.f32.mxu1 %v269_v53 }
 0x110   :  { %v272_v55 = vpop.f32.mrb[15].mxu0 }
 0x111   :  { %673 = vmatmul.mubr.f32.gmra.mrb[12].mxu1 %v272_v55 }
 0x112   :  { %675 = vmatprep.mubr.f32.mxu1 %v620_v52 }
 0x115   :  { %676 = vmatmul.mubr.f32.gmra.mrb[14].mxu1 %v621_v54 }
 0x1cc   :  { %v656_v57 = vpop.f32.mrb[0].mxu1 }
 0x1cd   :  { %v430_v58 = vadd.f32 %v656_v57, %v541_v56  ;;  %v424_v59 = vpop.f32.mrb[1].mxu1 }
 0x1ce   :  { %v425_v60 = vadd.f32 %v541_v56, %v424_v59 }
 0x1cf   :  { %504 = vst [vmem:[%s902_s4 + $0x8] sm:$0xff] %v430_v58 }
 0x1d0   :  { %503 = vst [vmem:[%s902_s4] sm:$0xff] %v425_v60  ;;  %v659_v61 = vpop.f32.mrb[2].mxu1 }
 0x1d1   :  { %v440_v62 = vadd.f32 %v659_v61, %v541_v56  ;;  %v434_v63 = vpop.f32.mrb[3].mxu1 }
 0x1d2   :  { %v435_v0 = vadd.f32 %v541_v56, %v434_v63 }
 0x1d3   :  { %506 = vst [vmem:[%s902_s4 + $0x18] sm:$0xff] %v440_v62 }
 0x1d4   :  { %505 = vst [vmem:[%s902_s4 + $0x10] sm:$0xff] %v435_v0  ;;  %v662_v1 = vpop.f32.mrb[4].mxu1 }
 0x1d5   :  { %v450_v2 = vadd.f32 %v662_v1, %v541_v56  ;;  %v444_v3 = vpop.f32.mrb[5].mxu1 }
 0x1d6   :  { %v445_v4 = vadd.f32 %v541_v56, %v444_v3 }
 0x1d7   :  { %508 = vst [vmem:[%s902_s4 + $0x28] sm:$0xff] %v450_v2 }
 0x1d8   :  { %507 = vst [vmem:[%s902_s4 + $0x20] sm:$0xff] %v445_v4  ;;  %v665_v5 = vpop.f32.mrb[6].mxu1 }
 0x1d9   :  { %v460_v6 = vadd.f32 %v665_v5, %v541_v56  ;;  %v454_v7 = vpop.f32.mrb[7].mxu1 }
 0x1da   :  { %v455_v8 = vadd.f32 %v541_v56, %v454_v7 }
 0x1db   :  { %510 = vst [vmem:[%s902_s4 + $0x38] sm:$0xff] %v460_v6 }
 0x1dc   :  { %509 = vst [vmem:[%s902_s4 + $0x30] sm:$0xff] %v455_v8  ;;  %v668_v9 = vpop.f32.mrb[8].mxu1 }
 0x1dd   :  { %v470_v10 = vadd.f32 %v668_v9, %v541_v56  ;;  %v464_v11 = vpop.f32.mrb[9].mxu1 }
 0x1de   :  { %v465_v12 = vadd.f32 %v541_v56, %v464_v11 }
 0x1df   :  { %512 = vst [vmem:[%s902_s4 + $0x48] sm:$0xff] %v470_v10 }
 0x1e0   :  { %511 = vst [vmem:[%s902_s4 + $0x40] sm:$0xff] %v465_v12  ;;  %v671_v13 = vpop.f32.mrb[10].mxu1 }
 0x1e1   :  { %v480_v14 = vadd.f32 %v671_v13, %v541_v56  ;;  %v474_v15 = vpop.f32.mrb[11].mxu1 }
 0x1e2   :  { %v475_v16 = vadd.f32 %v541_v56, %v474_v15 }
 0x1e3   :  { %514 = vst [vmem:[%s902_s4 + $0x58] sm:$0xff] %v480_v14 }
 0x1e4   :  { %513 = vst [vmem:[%s902_s4 + $0x50] sm:$0xff] %v475_v16  ;;  %v674_v17 = vpop.f32.mrb[12].mxu1 }
 0x1e5   :  { %v490_v18 = vadd.f32 %v674_v17, %v541_v56  ;;  %v484_v19 = vpop.f32.mrb[13].mxu1 }
 0x1e6   :  { %v485_v20 = vadd.f32 %v541_v56, %v484_v19 }
 0x1e7   :  { %516 = vst [vmem:[%s902_s4 + $0x68] sm:$0xff] %v490_v18 }
 0x1e8   :  { %515 = vst [vmem:[%s902_s4 + $0x60] sm:$0xff] %v485_v20  ;;  %v677_v21 = vpop.f32.mrb[14].mxu1 }
 0x1e9   :  { %v500_v22 = vadd.f32 %v677_v21, %v541_v56  ;;  %v494_v23 = vpop.f32.mrb[15].mxu1 }
 0x1ea   :  { %v495_v24 = vadd.f32 %v541_v56, %v494_v23 }
 0x1eb   :  { %518 = vst [vmem:[%s902_s4 + $0x78] sm:$0xff] %v500_v22 }
 0x1ec   :  { %517 = vst [vmem:[%s902_s4 + $0x70] sm:$0xff] %v495_v24 }

// kernel: gcn_forward.2
= control target key start
LH: loop header
LB: loop body
LE: loop exit
PB: predicated region body
PF: predicated region fallthrough
CT: control target
= control target key end

     0   :  { %s1033_s1 = inlined_call_operand.vmem [shape: bf16[128,128], index: 1, kind: input, shape index: {}]   ;;  %s1034_s0 = inlined_call_operand.vmem [shape: bf16[128,128], index: 0, kind: input, shape index: {}]   ;;  %s1035_s2 = inlined_call_operand.vmem [shape: f32[128,128], index: 2, kind: input, shape index: {}]   ;;  %s1036_s3 = inlined_call_operand.vmem [shape: f32[1,128], index: 3, kind: input, shape index: {}]   ;;  %s1037_s4 = inlined_call_operand.vmem [shape: bf16[128,128], index: 4, kind: output, shape index: {}]  }
   0x1   :  { %v869_v0 = vld [vmem:[%s1033_s1] sm:$0xff]   ;;  %v870_v1 = vld [vmem:[%s1033_s1 + $0x8] sm:$0xff]   ;;  %v871_v2 = vld [vmem:[%s1033_s1 + $0x10] sm:$0xff]  }
   0x2   :  { %749 = vmatprep.subr.bf16.mxu0 %v869_v0  ;;  %v872_v3 = vld [vmem:[%s1033_s1 + $0x18] sm:$0xff]   ;;  %v877_v4 = vld [vmem:[%s1034_s0] sm:$0xff]   ;;  %v874_v6 = vld [vmem:[%s1033_s1 + $0x28] sm:$0xff]  }
   0x3   :  { %750 = vmatpush3.bf16.msra.mxu0 %v869_v0  ;;  %765 = vmatprep.mubr.bf16.mxu0 %v877_v4  ;;  %v873_v5 = vld [vmem:[%s1033_s1 + $0x20] sm:$0xff]   ;;  %v336_v8 = vld [vmem:[%s1035_s2 + $0x8] sm:$0xff]  ;;  %v337_v9 = vld [vmem:[%s1035_s2 + $0x10] sm:$0xff] }
   0x4   :  { %751 = vmatprep.subr.bf16.mxu0 %v870_v1  ;;  %v335_v7 = vld [vmem:[%s1035_s2] sm:$0xff]  ;;  %v338_v11 = vld [vmem:[%s1035_s2 + $0x18] sm:$0xff]  ;;  %v340_v14 = vld [vmem:[%s1035_s2 + $0x28] sm:$0xff] }
   0x5   :  { %v837_v10 = vpack.c.bf16 %v336_v8, %v335_v7  ;;  %v841_v12 = vpack.c.bf16 %v338_v11, %v337_v9  ;;  %v339_v13 = vld [vmem:[%s1035_s2 + $0x20] sm:$0xff]  ;;  %v875_v15 = vld [vmem:[%s1033_s1 + $0x30] sm:$0xff]   ;;  %v342_v18 = vld [vmem:[%s1035_s2 + $0x38] sm:$0xff] }
   0x6   :  { %v845_v16 = vpack.c.bf16 %v340_v14, %v339_v13  ;;  %v341_v17 = vld [vmem:[%s1035_s2 + $0x30] sm:$0xff]  ;;  %v876_v19 = vld [vmem:[%s1033_s1 + $0x38] sm:$0xff]   ;;  %v343_v21 = vld [vmem:[%s1035_s2 + $0x40] sm:$0xff] }
   0x7   :  { %752 = vmatpush3.bf16.msra.mxu0 %v870_v1  ;;  %838 = vmatprep.subr.bf16.mxu1 %v837_v10  ;;  %v849_v20 = vpack.c.bf16 %v342_v18, %v341_v17  ;;  %v344_v22 = vld [vmem:[%s1035_s2 + $0x48] sm:$0xff]  ;;  %v345_v25 = vld [vmem:[%s1035_s2 + $0x50] sm:$0xff]  ;;  %v346_v26 = vld [vmem:[%s1035_s2 + $0x58] sm:$0xff] }
   0x8   :  { %753 = vmatprep.subr.bf16.mxu0 %v871_v2  ;;  %840 = vmatpush3.bf16.msra.mxu1 %v837_v10  ;;  %v853_v23 = vpack.c.bf16 %v344_v22, %v343_v21  ;;  %v878_v24 = vld [vmem:[%s1034_s0 + $0x8] sm:$0xff]   ;;  %v879_v27 = vld [vmem:[%s1034_s0 + $0x10] sm:$0xff]   ;;  %v857_v28 = vpack.c.bf16 %v346_v26, %v345_v25  ;;  %v347_v29 = vld [vmem:[%s1035_s2 + $0x60] sm:$0xff] }
   0x9   :  { %842 = vmatprep.subr.bf16.mxu1 %v841_v12  ;;  %v348_v30 = vld [vmem:[%s1035_s2 + $0x68] sm:$0xff]  ;;  %v880_v32 = vld [vmem:[%s1034_s0 + $0x18] sm:$0xff]   ;;  %v881_v33 = vld [vmem:[%s1034_s0 + $0x20] sm:$0xff]  }
   0xa   :  { %v861_v31 = vpack.c.bf16 %v348_v30, %v347_v29  ;;  %v882_v34 = vld [vmem:[%s1034_s0 + $0x28] sm:$0xff]   ;;  %v883_v35 = vld [vmem:[%s1034_s0 + $0x30] sm:$0xff]   ;;  %v884_v36 = vld [vmem:[%s1034_s0 + $0x38] sm:$0xff]  }
   0xb   :  { %754 = vmatpush3.bf16.msra.mxu0 %v871_v2  ;;  %v349_v37 = vld [vmem:[%s1035_s2 + $0x70] sm:$0xff]  ;;  %v350_v38 = vld [vmem:[%s1035_s2 + $0x78] sm:$0xff]  ;;  %v621_v56 = vld [vmem:[%s1036_s3] ss:$0 sm:$0xff] }
   0xc   :  { %755 = vmatprep.subr.bf16.mxu0 %v872_v3  ;;  %844 = vmatpush3.bf16.msra.mxu1 %v841_v12  ;;  %v865_v39 = vpack.c.bf16 %v350_v38, %v349_v37 }
   0xd   :  { %846 = vmatprep.subr.bf16.mxu1 %v845_v16 }
   0xf   :  { %756 = vmatpush3.bf16.msra.mxu0 %v872_v3 }
  0x10   :  { %757 = vmatprep.subr.bf16.mxu0 %v873_v5  ;;  %848 = vmatpush3.bf16.msra.mxu1 %v845_v16 }
  0x11   :  { %850 = vmatprep.subr.bf16.mxu1 %v849_v20 }
  0x13   :  { %758 = vmatpush3.bf16.msra.mxu0 %v873_v5 }
  0x14   :  { %759 = vmatprep.subr.bf16.mxu0 %v874_v6  ;;  %852 = vmatpush3.bf16.msra.mxu1 %v849_v20 }
  0x15   :  { %854 = vmatprep.subr.bf16.mxu1 %v853_v23 }
  0x17   :  { %760 = vmatpush3.bf16.msra.mxu0 %v874_v6 }
  0x18   :  { %761 = vmatprep.subr.bf16.mxu0 %v875_v15  ;;  %856 = vmatpush3.bf16.msra.mxu1 %v853_v23 }
  0x19   :  { %858 = vmatprep.subr.bf16.mxu1 %v857_v28 }
  0x1b   :  { %762 = vmatpush3.bf16.msra.mxu0 %v875_v15 }
  0x1c   :  { %763 = vmatprep.subr.bf16.mxu0 %v876_v19  ;;  %860 = vmatpush3.bf16.msra.mxu1 %v857_v28 }
  0x1d   :  { %862 = vmatprep.subr.bf16.mxu1 %v861_v31 }
  0x1f   :  { %764 = vmatpush3.bf16.msra.mxu0 %v876_v19 }
  0x20   :  { %864 = vmatpush3.bf16.msra.mxu1 %v861_v31 }
  0x21   :  { %866 = vmatprep.subr.bf16.mxu1 %v865_v39 }
  0x22   :  { %766 = vmatmul.mubr.bf16.vlgmr.msra.gmra.mrb[0].mxu0 %v878_v24 }
  0x23   :  { %769 = vmatprep.mubr.bf16.mxu0 %v879_v27 }
  0x24   :  { %868 = vmatpush3.bf16.msra.mxu1 %v865_v39 }
  0x2a   :  { %770 = vmatmul.mubr.bf16.gmra.mrb[4].mxu0 %v880_v32 }
  0x2b   :  { %773 = vmatprep.mubr.bf16.mxu0 %v881_v33 }
  0x32   :  { %774 = vmatmul.mubr.bf16.gmra.mrb[8].mxu0 %v882_v34 }
  0x33   :  { %777 = vmatprep.mubr.bf16.mxu0 %v883_v35 }
  0x3a   :  { %778 = vmatmul.mubr.bf16.gmra.mrb[12].mxu0 %v884_v36 }
  0xf5   :  { %v767_v40 = vpop.f32.mrb[0].mxu0 }
  0xf6   :  { %v221_v41 = vpop.f32.mrb[1].mxu0 }
  0xf7   :  { %v768_v42 = vpop.f32.mrb[2].mxu0  ;;  %813 = vmatprep.mubr.f32.mxu1 %v221_v41 }
  0xf8   :  { %v224_v43 = vpop.f32.mrb[3].mxu0 }
  0xf9   :  { %814 = vmatmul.mubr.f32.vlgmr.msra.gmra.mrb[0].mxu1 %v224_v43 }
  0xfa   :  { %816 = vmatprep.mubr.f32.mxu1 %v767_v40 }
  0xfd   :  { %v771_v44 = vpop.f32.mrb[4].mxu0  ;;  %817 = vmatmul.mubr.f32.gmra.mrb[2].mxu1 %v768_v42 }
  0xfe   :  { %v237_v45 = vpop.f32.mrb[5].mxu0 }
  0xff   :  { %v772_v46 = vpop.f32.mrb[6].mxu0  ;;  %819 = vmatprep.mubr.f32.mxu1 %v237_v45 }
 0x100   :  { %v240_v47 = vpop.f32.mrb[7].mxu0 }
 0x101   :  { %820 = vmatmul.mubr.f32.gmra.mrb[4].mxu1 %v240_v47 }
 0x102   :  { %822 = vmatprep.mubr.f32.mxu1 %v771_v44 }
 0x105   :  { %v775_v48 = vpop.f32.mrb[8].mxu0  ;;  %823 = vmatmul.mubr.f32.gmra.mrb[6].mxu1 %v772_v46 }
 0x106   :  { %v253_v49 = vpop.f32.mrb[9].mxu0 }
 0x107   :  { %v776_v50 = vpop.f32.mrb[10].mxu0  ;;  %825 = vmatprep.mubr.f32.mxu1 %v253_v49 }
 0x108   :  { %v256_v51 = vpop.f32.mrb[11].mxu0 }
 0x109   :  { %826 = vmatmul.mubr.f32.gmra.mrb[8].mxu1 %v256_v51 }
 0x10a   :  { %828 = vmatprep.mubr.f32.mxu1 %v775_v48 }
 0x10d   :  { %v779_v52 = vpop.f32.mrb[12].mxu0  ;;  %829 = vmatmul.mubr.f32.gmra.mrb[10].mxu1 %v776_v50 }
 0x10e   :  { %v269_v53 = vpop.f32.mrb[13].mxu0 }
 0x10f   :  { %v780_v54 = vpop.f32.mrb[14].mxu0  ;;  %831 = vmatprep.mubr.f32.mxu1 %v269_v53 }
 0x110   :  { %v272_v55 = vpop.f32.mrb[15].mxu0 }
 0x111   :  { %832 = vmatmul.mubr.f32.gmra.mrb[12].mxu1 %v272_v55 }
 0x112   :  { %834 = vmatprep.mubr.f32.mxu1 %v779_v52 }
 0x115   :  { %835 = vmatmul.mubr.f32.gmra.mrb[14].mxu1 %v780_v54 }
 0x1cc   :  { %v815_v57 = vpop.f32.mrb[0].mxu1 }
 0x1cd   :  { %v430_v58 = vadd.f32 %v815_v57, %v621_v56  ;;  %v424_v59 = vpop.f32.mrb[1].mxu1 }
 0x1ce   :  { %v425_v60 = vadd.f32 %v621_v56, %v424_v59 }
 0x1cf   :  { %v504_v61 = vmax.f32 %v430_v58, 0.0 }
 0x1d0   :  { %v503_v62 = vmax.f32 %v425_v60, 0.0  ;;  %v818_v63 = vpop.f32.mrb[2].mxu1 }
 0x1d1   :  { %v440_v0 = vadd.f32 %v818_v63, %v621_v56  ;;  %v434_v1 = vpop.f32.mrb[3].mxu1 }
 0x1d2   :  { %v657_v2 = vpack.c.bf16 %v504_v61, %v503_v62  ;;  %v435_v3 = vadd.f32 %v621_v56, %v434_v1 }
 0x1d3   :  { %v506_v4 = vmax.f32 %v440_v0, 0.0 }
 0x1d4   :  { %658 = vst [vmem:[%s1037_s4] sm:$0xff] %v657_v2   ;;  %v505_v5 = vmax.f32 %v435_v3, 0.0  ;;  %v821_v6 = vpop.f32.mrb[4].mxu1 }
 0x1d5   :  { %v450_v7 = vadd.f32 %v821_v6, %v621_v56  ;;  %v444_v8 = vpop.f32.mrb[5].mxu1 }
 0x1d6   :  { %v662_v9 = vpack.c.bf16 %v506_v4, %v505_v5  ;;  %v445_v10 = vadd.f32 %v621_v56, %v444_v8 }
 0x1d7   :  { %v508_v11 = vmax.f32 %v450_v7, 0.0 }
 0x1d8   :  { %694 = vst [vmem:[%s1037_s4 + $0x8] sm:$0xff] %v662_v9   ;;  %v507_v12 = vmax.f32 %v445_v10, 0.0  ;;  %v824_v13 = vpop.f32.mrb[6].mxu1 }
 0x1d9   :  { %v460_v14 = vadd.f32 %v824_v13, %v621_v56  ;;  %v454_v15 = vpop.f32.mrb[7].mxu1 }
 0x1da   :  { %v667_v16 = vpack.c.bf16 %v508_v11, %v507_v12  ;;  %v455_v17 = vadd.f32 %v621_v56, %v454_v15 }
 0x1db   :  { %v510_v18 = vmax.f32 %v460_v14, 0.0 }
 0x1dc   :  { %695 = vst [vmem:[%s1037_s4 + $0x10] sm:$0xff] %v667_v16   ;;  %v509_v19 = vmax.f32 %v455_v17, 0.0  ;;  %v827_v20 = vpop.f32.mrb[8].mxu1 }
 0x1dd   :  { %v470_v21 = vadd.f32 %v827_v20, %v621_v56  ;;  %v464_v22 = vpop.f32.mrb[9].mxu1 }
 0x1de   :  { %v672_v23 = vpack.c.bf16 %v510_v18, %v509_v19  ;;  %v465_v24 = vadd.f32 %v621_v56, %v464_v22 }
 0x1df   :  { %v512_v25 = vmax.f32 %v470_v21, 0.0 }
 0x1e0   :  { %696 = vst [vmem:[%s1037_s4 + $0x18] sm:$0xff] %v672_v23   ;;  %v511_v26 = vmax.f32 %v465_v24, 0.0  ;;  %v830_v27 = vpop.f32.mrb[10].mxu1 }
 0x1e1   :  { %v480_v28 = vadd.f32 %v830_v27, %v621_v56  ;;  %v474_v29 = vpop.f32.mrb[11].mxu1 }
 0x1e2   :  { %v677_v30 = vpack.c.bf16 %v512_v25, %v511_v26  ;;  %v475_v31 = vadd.f32 %v621_v56, %v474_v29 }
 0x1e3   :  { %v514_v32 = vmax.f32 %v480_v28, 0.0 }
 0x1e4   :  { %697 = vst [vmem:[%s1037_s4 + $0x20] sm:$0xff] %v677_v30   ;;  %v513_v33 = vmax.f32 %v475_v31, 0.0  ;;  %v833_v34 = vpop.f32.mrb[12].mxu1 }
 0x1e5   :  { %v490_v35 = vadd.f32 %v833_v34, %v621_v56  ;;  %v484_v36 = vpop.f32.mrb[13].mxu1 }
 0x1e6   :  { %v682_v37 = vpack.c.bf16 %v514_v32, %v513_v33  ;;  %v485_v38 = vadd.f32 %v621_v56, %v484_v36 }
 0x1e7   :  { %v516_v39 = vmax.f32 %v490_v35, 0.0 }
 0x1e8   :  { %698 = vst [vmem:[%s1037_s4 + $0x28] sm:$0xff] %v682_v37   ;;  %v515_v40 = vmax.f32 %v485_v38, 0.0  ;;  %v836_v41 = vpop.f32.mrb[14].mxu1 }
 0x1e9   :  { %v500_v42 = vadd.f32 %v836_v41, %v621_v56  ;;  %v494_v43 = vpop.f32.mrb[15].mxu1 }
 0x1ea   :  { %v687_v44 = vpack.c.bf16 %v516_v39, %v515_v40  ;;  %v495_v45 = vadd.f32 %v621_v56, %v494_v43 }
 0x1eb   :  { %v518_v46 = vmax.f32 %v500_v42, 0.0 }
 0x1ec   :  { %699 = vst [vmem:[%s1037_s4 + $0x30] sm:$0xff] %v687_v44   ;;  %v517_v47 = vmax.f32 %v495_v45, 0.0 }
 0x1ee   :  { %v692_v48 = vpack.c.bf16 %v518_v46, %v517_v47 }
 0x1f0   :  { %700 = vst [vmem:[%s1037_s4 + $0x38] sm:$0xff] %v692_v48  }

</bundles_post_ra>
